<compile_context>
chip_gen: v5e
topology: v5e:2x2
jax: 0.10.0
libtpu: 0.0.40
codegen_flags: <defaults>
</compile_context>

<pallas_src>
import jax
import jax.numpy as jnp
from jax.experimental import pallas as pl
from jax.experimental.pallas import tpu as pltpu


def _round_up(x, m):
    return ((x + m - 1) // m) * m


def _choose_row_tile(n_rows, target):
    """Largest power-of-two row tile <= target that still leaves >= 2 grid steps
    (so v7x's two TensorCores both get work); never below 8-sublane granularity."""
    tn = max(8, target)
    while tn > 8 and n_rows <= tn:
        tn //= 2
    return tn


def _expand_kernel(x_ref, w_ref, b_ref, o_ref):
    # x_ref: (tn, C) bf16, w_ref: (C, Mp) bf16, b_ref: (1, Mp) f32, o_ref: (tn, Mp) f32
    acc = jnp.dot(x_ref[...], w_ref[...], preferred_element_type=jnp.float32)
    o_ref[...] = acc + b_ref[...]          # bias add in f32, lane-dense full-width store


def _matmul_bias_pallas(x2, w2, b2, tn):
    """(Np, C) @ (C, Mp) + (1, Mp) -> (Np, Mp).  Np % tn == 0, Mp % 128 == 0."""
    Np, C = x2.shape
    _, Mp = w2.shape
    grid_n = Np // tn
    return pl.pallas_call(
        _expand_kernel,
        out_shape=jax.ShapeDtypeStruct((Np, Mp), jnp.float32),
        grid_spec=pl.GridSpec(
            grid=(grid_n,),
            in_specs=[
                # streamed row tiles of X (default double-buffered pipeline)
                pl.BlockSpec((tn, C), lambda i: (i, 0)),
                # weight / bias are grid-invariant -> keep a single resident buffer
                pl.BlockSpec((C, Mp), lambda i: (0, 0),
                             pipeline_mode=pl.Buffered(1)),
                pl.BlockSpec((1, Mp), lambda i: (0, 0),
                             pipeline_mode=pl.Buffered(1)),
            ],
            out_specs=pl.BlockSpec((tn, Mp), lambda i: (i, 0)),
        ),
        compiler_params=pltpu.CompilerParams(
            dimension_semantics=("parallel",),
            vmem_limit_bytes=32 * 1024 * 1024,
        ),
    )(x2, w2, b2)


def final_patch_expanding_forward(x, weight, bias, patch_size, *,
                                  tn=512, compute_dtype=jnp.bfloat16):
    """
    x      : (B, D, H, W, C)                   -- channel-last tokens (module input)
    weight : (C, num_class, pD, pH, pW)        -- ConvTranspose3d weight
    bias   : (num_class,)                      -- ConvTranspose3d bias
    returns: (B, num_class, D*pD, H*pH, W*pW)  -- PyTorch module output (NCDHW), f32
    """
    B, D, H, W, C = x.shape
    num_class = weight.shape[1]
    pD, pH, pW = patch_size
    M = num_class * pD * pH * pW
    N = B * D * H * W

    # MXU operands in bf16 (accumulation stays f32 inside the kernel).
    x2 = x.reshape(N, C).astype(compute_dtype)
    w2 = weight.reshape(C, M).astype(compute_dtype)
    # bias depends only on the output channel -> broadcast over kernel positions (f32)
    b2 = jnp.broadcast_to(bias.astype(jnp.float32)[:, None],
                          (num_class, pD * pH * pW)).reshape(1, M)

    # Lane-dense output: pad M up to a multiple of 128 (padded columns are exact zeros).
    Mp = _round_up(max(M, 1), 128)
    if Mp != M:
        w2 = jnp.pad(w2, ((0, 0), (0, Mp - M)))
        b2 = jnp.pad(b2, ((0, 0), (0, Mp - M)))

    # Row tiling: big tiles for throughput, pad N instead of asserting divisibility.
    tile = _choose_row_tile(N, tn)
    grid_n = pl.cdiv(N, tile)
    Np = grid_n * tile
    if Np != N:
        x2 = jnp.pad(x2, ((0, Np - N), (0, 0)))

    y2 = _matmul_bias_pallas(x2, w2, b2, tile)        # (Np, Mp) f32
    y2 = y2[:N, :M]                                   # drop row / lane padding

    # Pure layout scatter of each token's (nc, pD, pH, pW) patch into NCDHW.
    # (Interleaves row-derived (d,h,w) with column-derived (i,j,k) indices, so it is
    #  not expressible as a rectangular Pallas output block; left to one XLA transpose.)
    y = y2.reshape(B, D, H, W, num_class, pD, pH, pW)
    y = jnp.transpose(y, (0, 4, 1, 5, 2, 6, 3, 7))    # (B, nc, D, pD, H, pH, W, pW)
    return y.reshape(B, num_class, D * pD, H * pH, W * pW)


if __name__ == "__main__":
    key = jax.random.PRNGKey(0)
    k_x, k_w, k_b = jax.random.split(key, 3)

    # Small shapes consistent with the module.
    Bsz, D, H, W = 2, 4, 4, 4          # token grid
    dim = 32                            # embedding dim (C)
    num_class = 4
    patch_size = (2, 2, 2)

    x = jax.random.normal(k_x, (Bsz, D, H, W, dim), dtype=jnp.float32)
    weight = (jax.random.normal(
        k_w, (dim, num_class) + patch_size, dtype=jnp.float32) * 0.05)
    bias = jax.random.normal(k_b, (num_class,), dtype=jnp.float32) * 0.01

    out = final_patch_expanding_forward(x, weight, bias, patch_size)
    out = jax.block_until_ready(out)

    # Reference: ConvTranspose3d with stride == kernel_size, full-precision f32.
    ref = jnp.einsum('bdhwc,coijk->bodihjwk', x, weight,
                     precision=jax.lax.Precision.HIGHEST)
    ref = ref.reshape(Bsz, num_class, D * patch_size[0],
                      H * patch_size[1], W * patch_size[2])
    ref = ref + bias[None, :, None, None, None]

    assert out.shape == (Bsz, num_class, D * patch_size[0],
                         H * patch_size[1], W * patch_size[2])
    assert out.dtype == jnp.float32
    # bf16 MXU operands (f32 accumulation) vs f32 reference -> loose-but-safe tolerance.
    assert jnp.allclose(out, ref, atol=2e-2, rtol=2e-2)
    print("KERNEL_OK")
</pallas_src>

<mosaic_0001>
module attributes {stable_mosaic.version = 11 : i64} {
  func.func @_expand_kernel(%arg0: i32, %arg1: memref<64x32xbf16, #tpu.memory_space<vmem>>, %arg2: memref<32x128xbf16, #tpu.memory_space<vmem>>, %arg3: memref<1x128xf32, #tpu.memory_space<vmem>>, %arg4: memref<64x128xf32, #tpu.memory_space<vmem>>) attributes {dimension_semantics = [#tpu.dimension_semantics<parallel>], iteration_bounds = array<i64: 2>, scalar_prefetch = 0 : i64, scratch_operands = 0 : i64, tpu.core_type = #tpu.core_type<tc>, window_params = [{transform_indices = @transform_0, window_bounds = array<i64: 64, 32>}, {pipeline_mode = #tpu.pipeline_mode<synchronous>, transform_indices = @transform_1, window_bounds = array<i64: 32, 128>}, {pipeline_mode = #tpu.pipeline_mode<synchronous>, transform_indices = @transform_2, window_bounds = array<i64: 1, 128>}, {transform_indices = @transform_3, window_bounds = array<i64: 64, 128>}]} {
    %c0 = arith.constant 0 : index
    %c0_0 = arith.constant 0 : index
    %0 = vector.load %arg1[%c0, %c0_0] : memref<64x32xbf16, #tpu.memory_space<vmem>>, vector<64x32xbf16>
    %c0_1 = arith.constant 0 : index
    %c0_2 = arith.constant 0 : index
    %1 = vector.load %arg2[%c0_1, %c0_2] : memref<32x128xbf16, #tpu.memory_space<vmem>>, vector<32x128xbf16>
    %cst = arith.constant dense<0.000000e+00> : vector<64x128xf32>
    %2 = tpu.matmul %0, %1, %cst {dimension_numbers = #tpu.dot_dimension_numbers<[1], [0], [0], [1], [0, 0, 1, 1], [], []>} : vector<64x32xbf16>, vector<32x128xbf16>, vector<64x128xf32> -> vector<64x128xf32>
    %c0_3 = arith.constant 0 : index
    %c0_4 = arith.constant 0 : index
    %3 = vector.load %arg3[%c0_3, %c0_4] : memref<1x128xf32, #tpu.memory_space<vmem>>, vector<1x128xf32>
    %4 = vector.broadcast %3 : vector<1x128xf32> to vector<64x128xf32>
    %5 = arith.addf %2, %4 : vector<64x128xf32>
    %c0_5 = arith.constant 0 : index
    %c0_6 = arith.constant 0 : index
    %6 = vector.load %arg4[%c0_5, %c0_6] : memref<64x128xf32, #tpu.memory_space<vmem>>, vector<64x128xf32>
    tpu.vector_store %arg4[%c0_5, %c0_6], %5 {strides = array<i32>} : memref<64x128xf32, #tpu.memory_space<vmem>>, vector<64x128xf32>,
    return
  }
  func.func @transform_0(%arg0: i32) -> (i32, i32) {
    %c0_i32 = arith.constant 0 : i32
    %c0_i32_0 = arith.constant 0 : i32
    return %arg0, %c0_i32 : i32, i32
  }
  func.func @transform_1(%arg0: i32) -> (i32, i32) {
    %c0_i32 = arith.constant 0 : i32
    %c0_i32_0 = arith.constant 0 : i32
    %c0_i32_1 = arith.constant 0 : i32
    return %c0_i32, %c0_i32_0 : i32, i32
  }
  func.func @transform_2(%arg0: i32) -> (i32, i32) {
    %c0_i32 = arith.constant 0 : i32
    %c0_i32_0 = arith.constant 0 : i32
    %c0_i32_1 = arith.constant 0 : i32
    return %c0_i32, %c0_i32_0 : i32, i32
  }
  func.func @transform_3(%arg0: i32) -> (i32, i32) {
    %c0_i32 = arith.constant 0 : i32
    %c0_i32_0 = arith.constant 0 : i32
    return %arg0, %c0_i32 : i32, i32
  }
}

</mosaic_0001>

<bundles_post_ra>
// kernel: tpu_custom_call.1
= control target key start
LH: loop header
LB: loop body
LE: loop exit
PB: predicated region body
PF: predicated region fallthrough
CT: control target
= control target key end

     0   :  { %8 = vsyncpa [#allocation3], 0  ;;  %s627_s0 = inlined_call_operand.vmem [shape: bf16[128,32], index: 0, kind: input, shape index: {}]   ;;  %s628_s1 = inlined_call_operand.vmem [shape: bf16[32,128], index: 1, kind: input, shape index: {}]   ;;  %s629_s2 = inlined_call_operand.vmem [shape: f32[1,128], index: 2, kind: input, shape index: {}]   ;;  %s630_s3 = inlined_call_operand.hbm [shape: f32[128,128], index: 3, kind: output, shape index: {}]  }
   0x1   :  { %10 = vsyncpa [#allocation3 + $0x1], 0  ;;  %s530_s12 = smov 0   ;;  %s532_s13 = smov 0  }
   0x2   :  { %s534_s14 = smov 0   ;;  %s536_s15 = smov 0  }
   0x3 LB: > { %s551_s16 = sadd.s32 4294967295, %s506_s15   ;;  %s349_s17 = sadd.s32 4294967294, %s506_s15   ;;  %s506_s15 = sphi %s536_s15, %s636_s15   ;;  %s502_s14 = sphi %s534_s14, %s635_s14   ;;  %s498_s13 = sphi %s532_s13, %s634_s13   ;;  %s494_s12 = sphi %s530_s12, %s633_s12  }
   0x4   : > { %s555_s18 = sadd.s32 1, %s506_s15   ;;  %s91_s19 = sadd.s32 1, %s502_s14 }
   0x5   : > { %s88_s20 = ssub.s32 %s506_s15, %s555_s18  ;;  %p101_p0 = scmp.ne.s32.totalorder %s502_s14, %s498_s13 }
   0x6   : > { %p89_p1 = scmp.eq.s32.totalorder %s88_s20, 0  ;;  %p102_p2 = scmp.eq.s32.totalorder %s551_s16, 1 }
   0x7   : > { %p107_p3 = scmp.ne.s32.totalorder %s498_s13, %s494_s12  ;;  %p108_p4 = scmp.eq.s32.totalorder %s349_s17, 1 }
   0x8   : > { %s566_s21 = scalar_select %p89_p1, %s502_s14, %s91_s19  }
   0x9   : > { %p568_p5 = por %p102_p2, %p101_p0  ;;  %p572_p6 = por %p108_p4, %p107_p3 }
   0xa   : > { %p352_p7 = scmp.ge.s32.totalorder %s506_s15, 1  ;;  %p141_p8 = scmp.lt.s32.totalorder %s506_s15, 3 }
   0xc   : > { %p142_p9 = pnand %p352_p7, %p141_p8 }
   0xd   : > { %s354_s26 = sshll.u32 (!%p142_p9), %s551_s16, 3  ;;  %s162_s6 = sand.u32 (!%p142_p9), 1, %s498_s13  }
   0xe   : > { %145 = sbr.rel (%p142_p9) target bundleno = 175 (0xaf), region = 32  ;;  %p166_p10 = scmp.lt.s32.totalorder (!%p142_p9), %s354_s26, 15 }
   0xf   : > { %s353_s7 = sshll.u32 (!%p142_p9), %s162_s6, 6  ;;  %s395_s11 = sshll.u32 (!%p142_p9), %s551_s16, 6 }
  0x10   : > { %s164_s10 = scalar_lea.vmem (!%p142_p9), [#allocation2], %s353_s7  ;;  %s283_s20 = scalar_lea.hbm (!%p142_p9), %s630_s3, %s395_s11 }
  0x11   : > { %s284_s24 = sshll.u32 (!%p142_p9), %s164_s10, 4  ;;  %s286_s25 = sshll.u32 (!%p142_p9), %s283_s20, 4  ;;  %s285_s24 = int_to_ptr.vmem [resolvable:$true] %s284_s24  ;;  %s287_s25 = int_to_ptr.hbm [resolvable:$true] %s286_s25 }
  0x12   : > { %s272_s16 = scalar_lea.sflag (!%p142_p9), [#allocation3], %s162_s6  ;;  %s464_s30 = scalar_lea.hbm (!%p142_p9), %s630_s3, 128 }
  0x13   : > { %v394_v0 = vld [vmem:[%s628_s1 + $0x8] sm:$0xff]  ;;  %v393_v1 = vld [vmem:[%s628_s1] sm:$0xff]  ;;  %s638_s26 = smov (!%p166_p10, %s354_s26), 15  ;;  %vm221_vm0 = vcmask 261120  }
  0x14   : > { %240 = vmatpush.bf16.msra.mxu0 %v394_v0  ;;  %396 = vmatpush.bf16.msra.mxu1 %v394_v0  ;;  %s355_s29 = sshll.u32 %s638_s26, 2  ;;  %v443_v6 = vld [vmem:[%s629_s2] ss:$0 sm:$0xff]  ;;  %s458_s26 = sshra.s32 %s287_s25, 4  ;;  %s459_s26 = int_to_ptr.hbm [resolvable:$true] %s458_s26 }
  0x15   : > { %397 = vmatpush.bf16.msra.mxu2 %v394_v0  ;;  %398 = vmatpush.bf16.msra.mxu3 %v394_v0  ;;  %s169_s5 = scalar_lea.vmem %s627_s0, %s355_s29  ;;  %s460_s27 = scalar_lea.hbm %s459_s26, 64 }
  0x16   : > { %v389_v2 = vld [vmem:[%s169_s5] sm:$0xff]  ;;  %v390_v3 = vld [vmem:[%s169_s5 + $0x8] sm:$0xff]  ;;  %v391_v4 = vld [vmem:[%s169_s5 + $0x10] sm:$0xff]  ;;  %p461_p11 = scmp.ne.s32.totalorder %s459_s26, %s460_s27  ;;  %p465_p0 = scmp.lt.s32.totalorder %s459_s26, %s630_s3 }
  0x17   : > { %v392_v5 = vld [vmem:[%s169_s5 + $0x18] sm:$0xff]  ;;  %p466_p1 = scmp.lt.s32.totalorder %s464_s30, %s460_s27 }
  0x18   : > { %241 = vmatpush.bf16.msra.mxu0 %v393_v1  ;;  %399 = vmatpush.bf16.msra.mxu1 %v393_v1  ;;  %p462_p12 = pnand %p461_p11, %p568_p5 }
  0x19   : > { %400 = vmatpush.bf16.msra.mxu2 %v393_v1  ;;  %401 = vmatpush.bf16.msra.mxu3 %v393_v1  ;;  %p467_p2 = por %p466_p1, %p465_p0 }
  0x1a   : > { %p463_p13 = pneg %p462_p12 }
  0x1b   : > { %380 = vmatmul.msk.bf16.vlgmr.msra.gmra.mxu0 %vm221_vm0, %v389_v2  ;;  %381 = vmatmul.msk.bf16.vlgmr.msra.gmra.mxu1 %vm221_vm0, %v390_v3 }
  0x1c   : > { %382 = vmatmul.msk.bf16.vlgmr.msra.gmra.mxu2 %vm221_vm0, %v391_v4  ;;  %383 = vmatmul.msk.bf16.vlgmr.msra.gmra.mxu3 %vm221_vm0, %v392_v5  ;;  %p468_p3 = pnand %p467_p2, %p463_p13 }
  0x98   : > { %v243_v7 = vpop.f32.mrf.mxu0  ;;  %v248_v8 = vpop.f32.mrf.mxu1 }
  0x99   : > { %v244_v9 = vadd.f32 %v443_v6, %v243_v7  ;;  %v249_v10 = vadd.f32 %v443_v6, %v248_v8 }
  0x9b   : > { %263 = vst [vmem:[%s164_s10] sm:$0xff] %v244_v9 }
  0x9c   : > { %265 = vst [vmem:[%s164_s10 + $0x10] sm:$0xff] %v249_v10 }
  0x9f   : > { %v253_v11 = vpop.f32.mrf.mxu2  ;;  %v258_v12 = vpop.f32.mrf.mxu3 }
  0xa0   : > { %v254_v13 = vadd.f32 %v443_v6, %v253_v11  ;;  %v259_v14 = vadd.f32 %v443_v6, %v258_v12  ;;  %v245_v15 = vpop.f32.mrf.mxu0  ;;  %v250_v16 = vpop.f32.mrf.mxu1 }
  0xa1   : > { %v246_v17 = vadd.f32 %v443_v6, %v245_v15  ;;  %v251_v18 = vadd.f32 %v443_v6, %v250_v16 }
  0xa2   : > { %267 = vst [vmem:[%s164_s10 + $0x20] sm:$0xff] %v254_v13 }
  0xa3   : > { %269 = vst [vmem:[%s164_s10 + $0x30] sm:$0xff] %v259_v14 }
  0xa4   : > { %264 = vst [vmem:[%s164_s10 + $0x8] sm:$0xff] %v246_v17 }
  0xa5   : > { %266 = vst [vmem:[%s164_s10 + $0x18] sm:$0xff] %v251_v18 }
  0xa7   : > { %v255_v19 = vpop.f32.mrf.mxu2  ;;  %v260_v20 = vpop.f32.mrf.mxu3 }
  0xa8   : > { %v256_v21 = vadd.f32 %v443_v6, %v255_v19  ;;  %v261_v22 = vadd.f32 %v443_v6, %v260_v20 }
  0xaa   : > { %268 = vst [vmem:[%s164_s10 + $0x28] sm:$0xff] %v256_v21 }
  0xab   : > { %270 = vst [vmem:[%s164_s10 + $0x38] sm:$0xff] %v261_v22 }
  0xac   : > { %471 = shalt.err (!%p468_p3)
}
  0xad   : > { %s508_s6 = smov 128   ;;  %s509_s7 = smov 8  }
  0xae   : > { %402 = dma.vmem_to_hbm [thread:$0]  (%p568_p5), %s285_s24, 1024, %s287_s25, %s272_s16, %s508_s6, %s508_s6, %s509_s7  }
  0xaf PF: > { %p408_p4 = scmp.ge.s32.totalorder %s506_s15, 2  ;;  %s301_s8 = sand.u32 1, %s494_s12  }
  0xb0   : > { %s302_s9 = scalar_lea.sflag [#allocation3], %s301_s8 }
  0xb1   : > { %p405_p7 = pnand %p408_p4, %p572_p6 }
  0xb3   : > { %p406_p8 = pneg %p405_p7 }
  0xb5   : > { %489 = dma.done.wait (%p406_p8), %s302_s9, 1024  }
  0xb6   : > { %491 = vsyncadd (%p406_p8), %s302_s9, 4294966272  ;;  %p13_p9 = scmp.ge.s32.totalorder %s555_s18, 4   ;;  %s633_s12 = smov %s498_s13 }
  0xb7   : > { %s634_s13 = smov %s502_s14  ;;  %s635_s14 = smov %s566_s21 }
  0xb8   : > { %s636_s15 = smov %s555_s18  ;;  %15 = sbr.rel (!%p13_p9) target bundleno = 3 (0x3), region = 67 }
  0xbd   :  { %308 = vsyncpa [#allocation3], 1 }
  0xbe   :  { %310 = vsyncpa [#allocation3 + $0x1], 1 }

</bundles_post_ra>
